<compile_context>
chip_gen: v5e
topology: v5e:2x2
jax: 0.10.0
libtpu: 0.0.40
codegen_flags: <defaults>
</compile_context>

<pallas_src>
import math
import functools

import jax
import jax.numpy as jnp
from jax import lax
from jax.experimental import pallas as pl
from jax.experimental.pallas import tpu as pltpu


# ----------------------------------------------------------------------------
# Generic tiled matmul kernel:  y = x @ wt   (wt is already (K, N))
# ----------------------------------------------------------------------------
def _matmul_kernel(x_ref, w_ref, o_ref, acc_ref):
    @pl.when(pl.program_id(2) == 0)
    def _init():
        acc_ref[...] = jnp.zeros_like(acc_ref)

    acc_ref[...] += jnp.dot(
        x_ref[...], w_ref[...], preferred_element_type=jnp.float32
    )

    @pl.when(pl.program_id(2) == pl.num_programs(2) - 1)
    def _done():
        o_ref[...] = acc_ref[...].astype(o_ref.dtype)


def _tile(dim, target):
    if dim <= target:
        return dim
    assert dim % target == 0, f"dim {dim} must be a multiple of tile {target}"
    return target


def matmul_tiled(x, wt, *, tm=256, tn=256, tk=512):
    """x: (M, K), wt: (K, N) -> (M, N); fp32 accumulation, pipelined tiles."""
    M, K = x.shape
    K2, N = wt.shape
    assert K == K2
    tm, tn, tk = _tile(M, tm), _tile(N, tn), _tile(K, tk)
    return pl.pallas_call(
        _matmul_kernel,
        out_shape=jax.ShapeDtypeStruct((M, N), x.dtype),
        grid=(M // tm, N // tn, K // tk),
        in_specs=[
            pl.BlockSpec((tm, tk), lambda i, j, k: (i, k)),
            pl.BlockSpec((tk, tn), lambda i, j, k: (k, j)),
        ],
        out_specs=pl.BlockSpec((tm, tn), lambda i, j, k: (i, j)),
        scratch_shapes=[pltpu.VMEM((tm, tn), jnp.float32)],
        compiler_params=pltpu.CompilerParams(
            dimension_semantics=("parallel", "parallel", "arbitrary")
        ),
    )(x, wt)


# ----------------------------------------------------------------------------
# Fused RoPE + flash attention kernel (grid = (B, KVH, n_q_tiles, n_kv_tiles))
# ----------------------------------------------------------------------------
def _roll_half(x, d):
    # rotate_half without the sign (sign is folded into the sin tables):
    # [x2, x1] = roll(x, d//2) along the lane axis -> runs on the XLU slot.
    return pltpu.roll(x, d // 2, x.ndim - 1)


def _flash_attn_kernel(q_ref, k_ref, v_ref, cq_ref, sq_ref, ck_ref, sk_ref,
                       o_ref, qr_scr, acc_scr, m_scr, l_scr, *, g, head_dim):
    d = head_dim
    kt = pl.program_id(3)
    nkt = pl.num_programs(3)

    @pl.when(kt == 0)
    def _init():
        # Rotate + pre-scale Q once per (batch, kv-head, q-tile); cache in VMEM.
        cq = cq_ref[...]          # (tq, D)  cos * (1/sqrt(D))
        sq = sq_ref[...]          # (tq, D)  sin * sign * (1/sqrt(D))
        for h in range(g):
            q_h = q_ref[:, h * d:(h + 1) * d].astype(jnp.float32)
            qr_scr[h] = q_h * cq + _roll_half(q_h, d) * sq
        m_scr[...] = jnp.full(m_scr.shape, -jnp.inf, m_scr.dtype)
        l_scr[...] = jnp.zeros(l_scr.shape, l_scr.dtype)
        acc_scr[...] = jnp.zeros(acc_scr.shape, acc_scr.dtype)

    # Rotate K once per kv tile -- shared by all g grouped query heads (GQA).
    k = k_ref[...].astype(jnp.float32)                        # (tkv, D)
    kr = k * ck_ref[...] + _roll_half(k, d) * sk_ref[...]     # (tkv, D)
    v = v_ref[...]                                            # (tkv, D)

    for h in range(g):
        # scores: (tq, tkv), contraction over D (no materialized transpose).
        s = lax.dot_general(
            qr_scr[h], kr, (((1,), (1,)), ((), ())),
            preferred_element_type=jnp.float32,
        )
        m_prev = m_scr[h]                                     # (tq, 1)
        m_new = jnp.maximum(m_prev, jnp.max(s, axis=-1, keepdims=True))
        alpha = jnp.exp(m_prev - m_new)
        p = jnp.exp(s - m_new)                                # fp32 softmax numerator
        l_scr[h] = alpha * l_scr[h] + jnp.sum(p, axis=-1, keepdims=True)
        acc_scr[h] = alpha * acc_scr[h] + jnp.dot(
            p.astype(v.dtype), v, preferred_element_type=jnp.float32
        )
        m_scr[h] = m_new

    @pl.when(kt == nkt - 1)
    def _finalize():
        for h in range(g):
            l_h = l_scr[h]
            inv = pl.reciprocal(l_h, approx=True)
            inv = inv * (2.0 - l_h * inv)        # one Newton step (EUP + cheap VPU)
            o_ref[:, h * d:(h + 1) * d] = (acc_scr[h] * inv).astype(o_ref.dtype)


def flash_attention(qkv2d, cos, sin, *, batch, seq, num_heads, num_kv_heads,
                    head_dim, tq_target=256, tkv_target=512):
    """qkv2d: (B*S, (H+2*KVH)*D) fused projection output; returns (B*S, H*D)."""
    B, S, H, KVH, D = batch, seq, num_heads, num_kv_heads, head_dim
    g = H // KVH
    scale = 1.0 / math.sqrt(D)

    tq = S if S <= tq_target else tq_target
    tkv = S if S <= tkv_target else tkv_target
    assert S % tq == 0 and S % tkv == 0
    nqt, nkt = S // tq, S // tkv

    # RoPE tables: sign of rotate_half folded into sin; 1/sqrt(D) folded into
    # the Q tables so the score matrix never needs scaling.
    f32 = jnp.float32
    sign = jnp.concatenate(
        [jnp.full((D // 2,), -1.0, f32), jnp.ones((D // 2,), f32)]
    )
    cos_f = cos.astype(f32)
    sin_f = sin.astype(f32) * sign[None, :]
    cos_q, sin_q = cos_f * scale, sin_f * scale
    cos_k, sin_k = cos_f, sin_f

    kernel = functools.partial(_flash_attn_kernel, g=g, head_dim=D)
    M = B * S

    return pl.pallas_call(
        kernel,
        out_shape=jax.ShapeDtypeStruct((M, H * D), qkv2d.dtype),
        grid=(B, KVH, nqt, nkt),
        in_specs=[
            # Q: all g grouped heads of kv-head `kv`, rows of this (b, qt) tile.
            pl.BlockSpec((tq, g * D), lambda b, kv, qt, kt: (b * nqt + qt, kv)),
            # K / V: one kv head, one kv tile (column offsets inside qkv2d).
            pl.BlockSpec((tkv, D), lambda b, kv, qt, kt: (b * nkt + kt, H + kv)),
            pl.BlockSpec((tkv, D), lambda b, kv, qt, kt: (b * nkt + kt, H + KVH + kv)),
            # RoPE tables (Q-tile indexed / K-tile indexed).
            pl.BlockSpec((tq, D), lambda b, kv, qt, kt: (qt, 0)),
            pl.BlockSpec((tq, D), lambda b, kv, qt, kt: (qt, 0)),
            pl.BlockSpec((tkv, D), lambda b, kv, qt, kt: (kt, 0)),
            pl.BlockSpec((tkv, D), lambda b, kv, qt, kt: (kt, 0)),
        ],
        out_specs=pl.BlockSpec((tq, g * D),
                               lambda b, kv, qt, kt: (b * nqt + qt, kv)),
        scratch_shapes=[
            pltpu.VMEM((g, tq, D), jnp.float32),   # rotated, pre-scaled Q
            pltpu.VMEM((g, tq, D), jnp.float32),   # output accumulator
            pltpu.VMEM((g, tq, 1), jnp.float32),   # running max
            pltpu.VMEM((g, tq, 1), jnp.float32),   # running sum
        ],
        compiler_params=pltpu.CompilerParams(
            dimension_semantics=("parallel", "parallel", "parallel", "arbitrary")
        ),
    )(qkv2d, qkv2d, qkv2d, cos_q, sin_q, cos_k, sin_k)


# ----------------------------------------------------------------------------
# LlamaAttention module (forward only)
# ----------------------------------------------------------------------------
class LlamaAttentionPallas:
    def __init__(self, hidden_size, num_heads, num_key_value_heads,
                 max_position_embeddings=2048, rope_theta=10000.0, key=None):
        self.hidden_size = hidden_size
        self.num_heads = num_heads
        self.head_dim = hidden_size // num_heads
        self.num_key_value_heads = num_key_value_heads
        self.num_key_value_groups = num_heads // num_key_value_heads
        self.rope_theta = rope_theta
        assert self.head_dim * num_heads == hidden_size

        key = jax.random.PRNGKey(0) if key is None else key
        kq, kk, kv, ko = jax.random.split(key, 4)
        bound = 1.0 / math.sqrt(hidden_size)
        # torch.nn.Linear layout: (out_features, in_features), no bias.
        self.q_w = jax.random.uniform(kq, (num_heads * self.head_dim, hidden_size),
                                      jnp.float32, -bound, bound)
        self.k_w = jax.random.uniform(kk, (num_key_value_heads * self.head_dim, hidden_size),
                                      jnp.float32, -bound, bound)
        self.v_w = jax.random.uniform(kv, (num_key_value_heads * self.head_dim, hidden_size),
                                      jnp.float32, -bound, bound)
        self.o_w = jax.random.uniform(ko, (hidden_size, num_heads * self.head_dim),
                                      jnp.float32, -bound, bound)

        # Fuse + pre-transpose once at init (no per-call weight transpose).
        self.w_qkv_t = jnp.concatenate([self.q_w, self.k_w, self.v_w], axis=0).T
        self.o_w_t = self.o_w.T

    def _rotary(self, seq_len, dtype):
        dim = self.head_dim
        inv_freq = 1.0 / (self.rope_theta ** (jnp.arange(0, dim, 2, dtype=jnp.float32) / dim))
        t = jnp.arange(seq_len, dtype=jnp.float32)
        freqs = jnp.einsum("i,j->ij", t, inv_freq)
        emb = jnp.concatenate([freqs, freqs], axis=-1)          # (S, D)
        return jnp.cos(emb).astype(dtype), jnp.sin(emb).astype(dtype)

    def __call__(self, hidden_states):
        # NOTE: matches the module with attention_mask=None (no causal mask).
        B, S, _ = hidden_states.shape
        H, KVH, D = self.num_heads, self.num_key_value_heads, self.head_dim

        x2d = hidden_states.reshape(B * S, self.hidden_size)
        qkv2d = matmul_tiled(x2d, self.w_qkv_t)                 # (B*S, (H+2KVH)*D)

        cos, sin = self._rotary(S, hidden_states.dtype)
        attn2d = flash_attention(qkv2d, cos, sin, batch=B, seq=S,
                                 num_heads=H, num_kv_heads=KVH, head_dim=D)

        out2d = matmul_tiled(attn2d, self.o_w_t)                # (B*S, hidden)
        return out2d.reshape(B, S, self.hidden_size)


# ----------------------------------------------------------------------------
# Pure-JAX reference (mirrors the PyTorch forward with attention_mask=None)
# ----------------------------------------------------------------------------
def reference_forward(mod, hidden_states):
    B, S, _ = hidden_states.shape
    H, KVH, D = mod.num_heads, mod.num_key_value_heads, mod.head_dim
    q = (hidden_states @ mod.q_w.T).reshape(B, S, H, D).transpose(0, 2, 1, 3)
    k = (hidden_states @ mod.k_w.T).reshape(B, S, KVH, D).transpose(0, 2, 1, 3)
    v = (hidden_states @ mod.v_w.T).reshape(B, S, KVH, D).transpose(0, 2, 1, 3)
    cos, sin = mod._rotary(S, hidden_states.dtype)

    def rot_half(x):
        x1, x2 = x[..., : D // 2], x[..., D // 2:]
        return jnp.concatenate([-x2, x1], axis=-1)

    q = q * cos[None, None] + rot_half(q) * sin[None, None]
    k = k * cos[None, None] + rot_half(k) * sin[None, None]
    k = jnp.repeat(k, mod.num_key_value_groups, axis=1)
    v = jnp.repeat(v, mod.num_key_value_groups, axis=1)
    w = jnp.einsum("bhqd,bhkd->bhqk", q, k) / math.sqrt(D)
    w = jax.nn.softmax(w.astype(jnp.float32), axis=-1).astype(q.dtype)
    o = jnp.einsum("bhqk,bhkd->bhqd", w, v)
    o = o.transpose(0, 2, 1, 3).reshape(B, S, mod.hidden_size)
    return o @ mod.o_w.T


if __name__ == "__main__":
    # Small, lane-aligned config: batch=2, seq=8, head_dim=128,
    # heads=4, kv_heads=2 (GQA, group size 2)  =>  hidden = 512.
    B, S, NH, KVH, D = 2, 8, 4, 2, 128
    HIDDEN = NH * D

    key = jax.random.PRNGKey(0)
    k_x, k_w = jax.random.split(key)
    hidden_states = jax.random.normal(k_x, (B, S, HIDDEN), dtype=jnp.float32)

    mod = LlamaAttentionPallas(HIDDEN, NH, KVH, key=k_w)

    out = jax.block_until_ready(mod(hidden_states))

    ref = reference_forward(mod, hidden_states)
    assert out.shape == (B, S, HIDDEN)
    max_err = jnp.max(jnp.abs(out - ref))
    assert jnp.allclose(out, ref, atol=2e-3, rtol=2e-3), f"max abs err {max_err}"

    print("KERNEL_OK")
</pallas_src>

<mosaic_0001>
module attributes {stable_mosaic.version = 11 : i64} {
  func.func @_matmul_kernel(%arg0: i32, %arg1: i32, %arg2: i32, %arg3: memref<16x512xf32, #tpu.memory_space<vmem>>, %arg4: memref<512x256xf32, #tpu.memory_space<vmem>>, %arg5: memref<16x256xf32, #tpu.memory_space<vmem>>, %arg6: memref<16x256xf32, #tpu.memory_space<vmem>>) attributes {dimension_semantics = [#tpu.dimension_semantics<parallel>, #tpu.dimension_semantics<parallel>, #tpu.dimension_semantics<arbitrary>], iteration_bounds = array<i64: 1, 4, 1>, scalar_prefetch = 0 : i64, scratch_operands = 1 : i64, tpu.core_type = #tpu.core_type<tc>, window_params = [{transform_indices = @transform_0, window_bounds = array<i64: 16, 512>}, {transform_indices = @transform_1, window_bounds = array<i64: 512, 256>}, {transform_indices = @transform_2, window_bounds = array<i64: 16, 256>}]} {
    %c0_i32 = arith.constant 0 : i32
    %0 = arith.cmpi eq, %arg2, %c0_i32 : i32
    %1 = arith.extui %0 : i1 to i32
    %c0_i32_0 = arith.constant 0 : i32
    %2 = arith.cmpi ne, %1, %c0_i32_0 : i32
    scf.if %2 {
      %cst_10 = arith.constant 0.000000e+00 : f32
      %12 = vector.broadcast %cst_10 : f32 to vector<16x256xf32>
      %c0_11 = arith.constant 0 : index
      %c0_12 = arith.constant 0 : index
      %13 = vector.load %arg6[%c0_11, %c0_12] : memref<16x256xf32, #tpu.memory_space<vmem>>, vector<16x256xf32>
      tpu.vector_store %arg6[%c0_11, %c0_12], %12 {strides = array<i32>} : memref<16x256xf32, #tpu.memory_space<vmem>>, vector<16x256xf32>,
    } else {
    }
    %c0 = arith.constant 0 : index
    %c0_1 = arith.constant 0 : index
    %3 = vector.load %arg6[%c0, %c0_1] : memref<16x256xf32, #tpu.memory_space<vmem>>, vector<16x256xf32>
    %c0_2 = arith.constant 0 : index
    %c0_3 = arith.constant 0 : index
    %4 = vector.load %arg3[%c0_2, %c0_3] : memref<16x512xf32, #tpu.memory_space<vmem>>, vector<16x512xf32>
    %c0_4 = arith.constant 0 : index
    %c0_5 = arith.constant 0 : index
    %5 = vector.load %arg4[%c0_4, %c0_5] : memref<512x256xf32, #tpu.memory_space<vmem>>, vector<512x256xf32>
    %cst = arith.constant dense<0.000000e+00> : vector<16x256xf32>
    %6 = tpu.matmul %4, %5, %cst {dimension_numbers = #tpu.dot_dimension_numbers<[1], [0], [0], [1], [0, 0, 1, 1], [], []>} : vector<16x512xf32>, vector<512x256xf32>, vector<16x256xf32> -> vector<16x256xf32>
    %7 = arith.addf %3, %6 : vector<16x256xf32>
    %c0_6 = arith.constant 0 : index
    %c0_7 = arith.constant 0 : index
    %8 = vector.load %arg6[%c0_6, %c0_7] : memref<16x256xf32, #tpu.memory_space<vmem>>, vector<16x256xf32>
    tpu.vector_store %arg6[%c0_6, %c0_7], %7 {strides = array<i32>} : memref<16x256xf32, #tpu.memory_space<vmem>>, vector<16x256xf32>,
    %c0_i32_8 = arith.constant 0 : i32
    %9 = arith.cmpi eq, %arg2, %c0_i32_8 : i32
    %10 = arith.extui %9 : i1 to i32
    %c0_i32_9 = arith.constant 0 : i32
    %11 = arith.cmpi ne, %10, %c0_i32_9 : i32
    scf.if %11 {
      %c0_10 = arith.constant 0 : index
      %c0_11 = arith.constant 0 : index
      %12 = vector.load %arg6[%c0_10, %c0_11] : memref<16x256xf32, #tpu.memory_space<vmem>>, vector<16x256xf32>
      %c0_12 = arith.constant 0 : index
      %c0_13 = arith.constant 0 : index
      %13 = vector.load %arg5[%c0_12, %c0_13] : memref<16x256xf32, #tpu.memory_space<vmem>>, vector<16x256xf32>
      tpu.vector_store %arg5[%c0_12, %c0_13], %12 {strides = array<i32>} : memref<16x256xf32, #tpu.memory_space<vmem>>, vector<16x256xf32>,
    } else {
    }
    return
  }
  func.func @transform_0(%arg0: i32, %arg1: i32, %arg2: i32) -> (i32, i32) {
    %c0_i32 = arith.constant 0 : i32
    return %arg0, %arg2 : i32, i32
  }
  func.func @transform_1(%arg0: i32, %arg1: i32, %arg2: i32) -> (i32, i32) {
    %c0_i32 = arith.constant 0 : i32
    return %arg2, %arg1 : i32, i32
  }
  func.func @transform_2(%arg0: i32, %arg1: i32, %arg2: i32) -> (i32, i32) {
    %c0_i32 = arith.constant 0 : i32
    return %arg0, %arg1 : i32, i32
  }
}

</mosaic_0001>

<bundles_post_ra>
// kernel: tpu_custom_call.1
= control target key start
LH: loop header
LB: loop body
LE: loop exit
PB: predicated region body
PF: predicated region fallthrough
CT: control target
= control target key end

     0   :  { %7 = vsyncpa [#allocation4], 0  ;;  %s1276_s0 = inlined_call_operand.hbm [shape: f32[16,512], index: 0, kind: input, shape index: {}]   ;;  %s1277_s1 = inlined_call_operand.hbm [shape: f32[512,1024], index: 1, kind: input, shape index: {}]   ;;  %s1278_s2 = inlined_call_operand.hbm [shape: f32[16,1024], index: 2, kind: output, shape index: {}]  }
   0x1   :  { %8 = vsyncpa [#allocation7], 0 }
   0x2   :  { %10 = vsyncpa [#allocation7 + $0x1], 0 }
   0x3   :  { %11 = vsyncpa [#allocation5], 0 }
   0x4   :  { %13 = vsyncpa [#allocation5 + $0x1], 0  ;;  %s975_s9 = smov 0   ;;  %s977_s10 = smov 0  }
   0x5   :  { %s979_s11 = smov 0   ;;  %s981_s12 = smov 0  }
   0x6   :  { %s983_s13 = smov 0   ;;  %s985_s14 = smov 0  }
   0x7 LB: > { %s703_s15 = sadd.s32 4294967295, %s949_s14   ;;  %s704_s16 = sadd.s32 4294967294, %s949_s14   ;;  %s949_s14 = sphi %s985_s14, %s19_s14   ;;  %s945_s13 = sphi %s983_s13, %s1290_s13   ;;  %s941_s12 = sphi %s981_s12, %s1289_s12   ;;  %s937_s11 = sphi %s979_s11, %s1288_s11   ;;  %s933_s10 = sphi %s977_s10, %s1287_s10   ;;  %s929_s9 = sphi %s975_s9, %s1286_s9  }
   0x8   : > { %p88_p0 = scmp.ne.s32.totalorder %s933_s10, %s929_s9  ;;  %p1009_p1 = scmp.eq.s32.totalorder %s703_s15, 0 }
   0x9   : > { %p1013_p2 = scmp.eq.s32.totalorder %s703_s15, 3  ;;  %p120_p3 = scmp.eq.s32.totalorder %s704_s16, 3 }
   0xa   : > { %p1019_p4 = por %p1009_p1, %p88_p0  ;;  %p705_p5 = scmp.ge.s32.totalorder %s949_s14, 1 }
   0xb   : > { %p1024_p6 = por %p120_p3, %p88_p0  ;;  %p127_p7 = scmp.lt.s32.totalorder %s949_s14, 5 }
   0xc   : > { %s144_s23 = sshll.u32 %s1276_s0, 4  ;;  %s951_s25 = smov [#allocation3]   ;;  %s145_s23 = int_to_ptr.hbm [resolvable:$true] %s144_s23 }
   0xd   : > { %p1032_p8 = pnand %p705_p5, %p127_p7  ;;  %s146_s26 = sshll.u32 %s951_s25, 4  ;;  %s147_s26 = int_to_ptr.vmem [resolvable:$true] %s146_s26 }
   0xe   : > { %s952_s27 = smov 512   ;;  %s953_s28 = smov 32  }
   0xf   : > { %p730_p9 = pneg %p1032_p8  ;;  %s34_s29 = sadd.s32 1, %s945_s13 }
  0x10   : > { %p36_p11 = scmp.ge.s32.totalorder %s34_s29, 4  ;;  %s75_s30 = sadd.s32 1, %s937_s11 }
  0x11   : > { %p731_p10 = pnand %p730_p9, %p1009_p1  ;;  %p82_p12 = scmp.ne.s32.totalorder %s937_s11, %s933_s10 }
  0x12   : > { %p83_p13 = scmp.eq.s32.totalorder %s949_s14, 0  ;;  %s1292_s29 = smov (%p36_p11, %s34_s29), 0 }
  0x13   : > { %733 = dma.hbm_to_vmem [thread:$0]  (!%p731_p10), %s145_s23, 1024, %s147_s26, [#allocation4], %s952_s27, %s952_s27, %s953_s28  }
  0x14   : > { %p1047_p0 = por %p83_p13, %p82_p12  ;;  %p1053_p3 = por %p1013_p2, %p82_p12 }
  0x15   : > { %s71_s5 = ssub.s32 %s945_s13, %s1292_s29  ;;  %p743_p5 = scmp.lt.s32.totalorder %s949_s14, 4 }
  0x16   : > { %p73_p7 = scmp.eq.s32.totalorder %s71_s5, 0  ;;  %s160_s6 = sand.u32 1, %s937_s11  }
  0x17   : > { %s708_s7 = sshll.u32 %s160_s6, 10  ;;  %s720_s15 = sshll.u32 %s945_s13, 4 }
  0x18   : > { %s1062_s8 = scalar_select %p73_p7, %s937_s11, %s75_s30  }
  0x19   : > { %s172_s22 = scalar_lea.hbm %s1277_s1, %s720_s15  ;;  %s164_s23 = scalar_lea.vmem [#allocation6], %s708_s7 }
  0x1a   : > { %s175_s25 = sshll.u32 %s164_s23, 4  ;;  %s173_s18 = sshll.u32 %s172_s22, 4  ;;  %s176_s25 = int_to_ptr.vmem [resolvable:$true] %s175_s25  ;;  %s174_s18 = int_to_ptr.hbm [resolvable:$true] %s173_s18 }
  0x1b   : > { %p735_p2 = pnand %p743_p5, %p1047_p0  ;;  %s161_s26 = scalar_lea.sflag [#allocation7], %s160_s6 }
  0x1c   : > { %s954_s27 = smov 1024   ;;  %s955_s28 = smov 256  }
  0x1d   : > { %s956_s5 = smov 16   ;;  %187 = sbr.rel (%p1032_p8) target bundleno = 256 (0x100), region = 28 }
  0x1e   : > { %737 = dma.hbm_to_vmem [thread:$0]  (!%p735_p2), %s174_s18, 16384, %s176_s25, %s161_s26, %s954_s27, %s955_s28, %s956_s5  }
  0x22   : > { %916 = dma.done.wait (%p1009_p1), [#allocation4], 1024  }
  0x23   : > { %918 = vsyncadd (%p1009_p1), [#allocation4], 4294966272  ;;  %s1077_s30 = sand.u32 1, %s933_s10  }
  0x24   : > { %s713_s3 = sshll.u32 %s1077_s30, 10  ;;  %s195_s6 = scalar_lea.sflag [#allocation7], %s1077_s30 }
  0x25   : > { %s1081_s7 = scalar_lea.vmem [#allocation6], %s713_s3 }
  0x26   : > { %920 = dma.done.wait (%p1019_p4), %s195_s6, 16384  }
  0x27   : > { %922 = vsyncadd (%p1019_p4), %s195_s6, 4294950912  ;;  %v340_v0 = vld [vmem:[%s1081_s7 + $0x2f0] sm:$0xff]  ;;  %v338_v1 = vld [vmem:[%s1081_s7 + $0x2e0] sm:$0xff]  ;;  %s714_s17 = sshll.u32 %s1077_s30, 5  ;;  %s721_s24 = sshll.u32 %s941_s12, 4 }
  0x28   : > { %v372_v2 = vld [vmem:[%s1081_s7 + $0x3f0] sm:$0xff]  ;;  %420 = vmatpush.msra.mxu2 %v340_v0  ;;  %v370_v6 = vld [vmem:[%s1081_s7 + $0x3e0] sm:$0xff]  ;;  %v341_v62 = vld [vmem:[%s1081_s7 + $0x2f8] sm:$0xff]  ;;  %s1232_s19 = scalar_lea.vmem [#allocation8], %s714_s17  ;;  %s592_s21 = scalar_lea.hbm %s1278_s2, %s721_s24 }
  0x29   : > { %443 = vmatpush.msra.mxu3 %v372_v2  ;;  %v276_v3 = vld [vmem:[%s1081_s7 + $0xf0] sm:$0xff]  ;;  %v274_v7 = vld [vmem:[%s1081_s7 + $0xe0] sm:$0xff]  ;;  %v373_v63 = vld [vmem:[%s1081_s7 + $0x3f8] sm:$0xff]  ;;  %s593_s22 = sshll.u32 %s1232_s19, 4  ;;  %s595_s23 = sshll.u32 %s592_s21, 4  ;;  %s594_s22 = int_to_ptr.vmem [resolvable:$true] %s593_s22  ;;  %s596_s23 = int_to_ptr.hbm [resolvable:$true] %s595_s23 }
  0x2a   : > { %v308_v4 = vld [vmem:[%s1081_s7 + $0x1f0] sm:$0xff]  ;;  %374 = vmatpush.msra.mxu0 %v276_v3  ;;  %v306_v8 = vld [vmem:[%s1081_s7 + $0x1e0] sm:$0xff]  ;;  %421 = vmatpush.msra.mxu2 %v338_v1  ;;  %v339_v2 = vld [vmem:[%s1081_s7 + $0x2e8] sm:$0xff]  ;;  %s578_s12 = scalar_lea.sflag [#allocation5], %s1077_s30  ;;  %s877_s25 = sshra.s32 %s596_s23, 4  ;;  %s878_s25 = int_to_ptr.hbm [resolvable:$true] %s877_s25 }
  0x2b   : > { %v336_v5 = vld [vmem:[%s1081_s7 + $0x2d0] sm:$0xff]  ;;  %397 = vmatpush.msra.mxu1 %v308_v4  ;;  %444 = vmatpush.msra.mxu3 %v370_v6  ;;  %v334_v11 = vld [vmem:[%s1081_s7 + $0x2c0] sm:$0xff]  ;;  %v277_v3 = vld [vmem:[%s1081_s7 + $0xf8] sm:$0xff]  ;;  %s879_s18 = scalar_lea.hbm %s878_s25, 32  ;;  %s883_s28 = scalar_lea.hbm %s1278_s2, 128 }
  0x2c   : > { %v368_v9 = vld [vmem:[%s1081_s7 + $0x3d0] sm:$0xff]  ;;  %375 = vmatpush.msra.mxu0 %v274_v7  ;;  %v366_v13 = vld [vmem:[%s1081_s7 + $0x3c0] sm:$0xff]  ;;  %422 = vmatpush.msra.mxu2 %v336_v5  ;;  %v309_v4 = vld [vmem:[%s1081_s7 + $0x1f8] sm:$0xff]  ;;  %p880_p1 = scmp.ne.s32.totalorder %s878_s25, %s879_s18  ;;  %p884_p9 = scmp.lt.s32.totalorder %s878_s25, %s1278_s2 }
  0x2d   : > { %v272_v10 = vld [vmem:[%s1081_s7 + $0xd0] sm:$0xff]  ;;  %398 = vmatpush.msra.mxu1 %v306_v8  ;;  %445 = vmatpush.msra.mxu3 %v368_v9  ;;  %v270_v14 = vld [vmem:[%s1081_s7 + $0xc0] sm:$0xff]  ;;  %v371_v5 = vld [vmem:[%s1081_s7 + $0x3e8] sm:$0xff]  ;;  %p885_p10 = scmp.lt.s32.totalorder %s883_s28, %s879_s18 }
  0x2e   : > { %v304_v12 = vld [vmem:[%s1081_s7 + $0x1d0] sm:$0xff]  ;;  %v302_v15 = vld [vmem:[%s1081_s7 + $0x1c0] sm:$0xff]  ;;  %376 = vmatpush.msra.mxu0 %v272_v10  ;;  %423 = vmatpush.msra.mxu2 %v334_v11  ;;  %v337_v6 = vld [vmem:[%s1081_s7 + $0x2d8] sm:$0xff]  ;;  %p881_p4 = pnand %p880_p1, %p1053_p3 }
  0x2f   : > { %399 = vmatpush.msra.mxu1 %v304_v12  ;;  %v332_v16 = vld [vmem:[%s1081_s7 + $0x2b0] sm:$0xff]  ;;  %446 = vmatpush.msra.mxu3 %v366_v13  ;;  %v330_v20 = vld [vmem:[%s1081_s7 + $0x2a0] sm:$0xff]  ;;  %v275_v7 = vld [vmem:[%s1081_s7 + $0xe8] sm:$0xff]  ;;  %p886_p11 = por %p885_p10, %p884_p9 }
  0x30   : > { %v364_v17 = vld [vmem:[%s1081_s7 + $0x3b0] sm:$0xff]  ;;  %377 = vmatpush.msra.mxu0 %v270_v14  ;;  %v362_v21 = vld [vmem:[%s1081_s7 + $0x3a0] sm:$0xff]  ;;  %424 = vmatpush.msra.mxu2 %v332_v16  ;;  %v307_v8 = vld [vmem:[%s1081_s7 + $0x1e8] sm:$0xff]  ;;  %p882_p8 = pneg %p881_p4 }
  0x31   : > { %v268_v18 = vld [vmem:[%s1081_s7 + $0xb0] sm:$0xff]  ;;  %400 = vmatpush.msra.mxu1 %v302_v15  ;;  %447 = vmatpush.msra.mxu3 %v364_v17  ;;  %v266_v22 = vld [vmem:[%s1081_s7 + $0xa0] sm:$0xff]  ;;  %v369_v9 = vld [vmem:[%s1081_s7 + $0x3d8] sm:$0xff] }
  0x32   : > { %v300_v19 = vld [vmem:[%s1081_s7 + $0x1b0] sm:$0xff]  ;;  %v298_v23 = vld [vmem:[%s1081_s7 + $0x1a0] sm:$0xff]  ;;  %378 = vmatpush.msra.mxu0 %v268_v18  ;;  %425 = vmatpush.msra.mxu2 %v330_v20  ;;  %v335_v10 = vld [vmem:[%s1081_s7 + $0x2c8] sm:$0xff]  ;;  %p887_p12 = pnand %p886_p11, %p882_p8 }
  0x33   : > { %401 = vmatpush.msra.mxu1 %v300_v19  ;;  %v328_v24 = vld [vmem:[%s1081_s7 + $0x290] sm:$0xff]  ;;  %448 = vmatpush.msra.mxu3 %v362_v21  ;;  %v326_v28 = vld [vmem:[%s1081_s7 + $0x280] sm:$0xff]  ;;  %v273_v11 = vld [vmem:[%s1081_s7 + $0xd8] sm:$0xff] }
  0x34   : > { %v360_v25 = vld [vmem:[%s1081_s7 + $0x390] sm:$0xff]  ;;  %379 = vmatpush.msra.mxu0 %v266_v22  ;;  %v358_v29 = vld [vmem:[%s1081_s7 + $0x380] sm:$0xff]  ;;  %426 = vmatpush.msra.mxu2 %v328_v24  ;;  %v305_v12 = vld [vmem:[%s1081_s7 + $0x1d8] sm:$0xff] }
  0x35   : > { %v264_v26 = vld [vmem:[%s1081_s7 + $0x90] sm:$0xff]  ;;  %402 = vmatpush.msra.mxu1 %v298_v23  ;;  %449 = vmatpush.msra.mxu3 %v360_v25  ;;  %v262_v30 = vld [vmem:[%s1081_s7 + $0x80] sm:$0xff]  ;;  %v367_v13 = vld [vmem:[%s1081_s7 + $0x3c8] sm:$0xff] }
  0x36   : > { %v296_v27 = vld [vmem:[%s1081_s7 + $0x190] sm:$0xff]  ;;  %v294_v31 = vld [vmem:[%s1081_s7 + $0x180] sm:$0xff]  ;;  %380 = vmatpush.msra.mxu0 %v264_v26  ;;  %427 = vmatpush.msra.mxu2 %v326_v28  ;;  %v333_v14 = vld [vmem:[%s1081_s7 + $0x2b8] sm:$0xff] }
  0x37   : > { %403 = vmatpush.msra.mxu1 %v296_v27  ;;  %v324_v32 = vld [vmem:[%s1081_s7 + $0x270] sm:$0xff]  ;;  %450 = vmatpush.msra.mxu3 %v358_v29  ;;  %v322_v36 = vld [vmem:[%s1081_s7 + $0x260] sm:$0xff]  ;;  %v271_v15 = vld [vmem:[%s1081_s7 + $0xc8] sm:$0xff] }
  0x38   : > { %v356_v33 = vld [vmem:[%s1081_s7 + $0x370] sm:$0xff]  ;;  %381 = vmatpush.msra.mxu0 %v262_v30  ;;  %v354_v37 = vld [vmem:[%s1081_s7 + $0x360] sm:$0xff]  ;;  %428 = vmatpush.msra.mxu2 %v324_v32  ;;  %v303_v16 = vld [vmem:[%s1081_s7 + $0x1c8] sm:$0xff] }
  0x39   : > { %v260_v34 = vld [vmem:[%s1081_s7 + $0x70] sm:$0xff]  ;;  %404 = vmatpush.msra.mxu1 %v294_v31  ;;  %451 = vmatpush.msra.mxu3 %v356_v33  ;;  %v258_v38 = vld [vmem:[%s1081_s7 + $0x60] sm:$0xff]  ;;  %v365_v17 = vld [vmem:[%s1081_s7 + $0x3b8] sm:$0xff] }
  0x3a   : > { %v292_v35 = vld [vmem:[%s1081_s7 + $0x170] sm:$0xff]  ;;  %v290_v39 = vld [vmem:[%s1081_s7 + $0x160] sm:$0xff]  ;;  %382 = vmatpush.msra.mxu0 %v260_v34  ;;  %429 = vmatpush.msra.mxu2 %v322_v36  ;;  %v331_v18 = vld [vmem:[%s1081_s7 + $0x2a8] sm:$0xff] }
  0x3b   : > { %405 = vmatpush.msra.mxu1 %v292_v35  ;;  %v320_v40 = vld [vmem:[%s1081_s7 + $0x250] sm:$0xff]  ;;  %452 = vmatpush.msra.mxu3 %v354_v37  ;;  %v318_v44 = vld [vmem:[%s1081_s7 + $0x240] sm:$0xff]  ;;  %v269_v19 = vld [vmem:[%s1081_s7 + $0xb8] sm:$0xff] }
  0x3c   : > { %v352_v41 = vld [vmem:[%s1081_s7 + $0x350] sm:$0xff]  ;;  %383 = vmatpush.msra.mxu0 %v258_v38  ;;  %v350_v45 = vld [vmem:[%s1081_s7 + $0x340] sm:$0xff]  ;;  %430 = vmatpush.msra.mxu2 %v320_v40  ;;  %v301_v20 = vld [vmem:[%s1081_s7 + $0x1b8] sm:$0xff] }
  0x3d   : > { %v256_v42 = vld [vmem:[%s1081_s7 + $0x50] sm:$0xff]  ;;  %406 = vmatpush.msra.mxu1 %v290_v39  ;;  %453 = vmatpush.msra.mxu3 %v352_v41  ;;  %v254_v46 = vld [vmem:[%s1081_s7 + $0x40] sm:$0xff]  ;;  %v363_v21 = vld [vmem:[%s1081_s7 + $0x3a8] sm:$0xff] }
  0x3e   : > { %v288_v43 = vld [vmem:[%s1081_s7 + $0x150] sm:$0xff]  ;;  %v286_v47 = vld [vmem:[%s1081_s7 + $0x140] sm:$0xff]  ;;  %384 = vmatpush.msra.mxu0 %v256_v42  ;;  %431 = vmatpush.msra.mxu2 %v318_v44  ;;  %v329_v22 = vld [vmem:[%s1081_s7 + $0x298] sm:$0xff] }
  0x3f   : > { %407 = vmatpush.msra.mxu1 %v288_v43  ;;  %v316_v48 = vld [vmem:[%s1081_s7 + $0x230] sm:$0xff]  ;;  %454 = vmatpush.msra.mxu3 %v350_v45  ;;  %v314_v52 = vld [vmem:[%s1081_s7 + $0x220] sm:$0xff]  ;;  %v267_v23 = vld [vmem:[%s1081_s7 + $0xa8] sm:$0xff] }
  0x40   : > { %v348_v49 = vld [vmem:[%s1081_s7 + $0x330] sm:$0xff]  ;;  %385 = vmatpush.msra.mxu0 %v254_v46  ;;  %v346_v53 = vld [vmem:[%s1081_s7 + $0x320] sm:$0xff]  ;;  %432 = vmatpush.msra.mxu2 %v316_v48  ;;  %v299_v24 = vld [vmem:[%s1081_s7 + $0x1a8] sm:$0xff] }
  0x41   : > { %v252_v50 = vld [vmem:[%s1081_s7 + $0x30] sm:$0xff]  ;;  %408 = vmatpush.msra.mxu1 %v286_v47  ;;  %455 = vmatpush.msra.mxu3 %v348_v49  ;;  %v250_v54 = vld [vmem:[%s1081_s7 + $0x20] sm:$0xff]  ;;  %v361_v25 = vld [vmem:[%s1081_s7 + $0x398] sm:$0xff] }
  0x42   : > { %v284_v51 = vld [vmem:[%s1081_s7 + $0x130] sm:$0xff]  ;;  %v282_v55 = vld [vmem:[%s1081_s7 + $0x120] sm:$0xff]  ;;  %386 = vmatpush.msra.mxu0 %v252_v50  ;;  %433 = vmatpush.msra.mxu2 %v314_v52  ;;  %v327_v26 = vld [vmem:[%s1081_s7 + $0x288] sm:$0xff] }
  0x43   : > { %409 = vmatpush.msra.mxu1 %v284_v51  ;;  %v312_v56 = vld [vmem:[%s1081_s7 + $0x210] sm:$0xff]  ;;  %456 = vmatpush.msra.mxu3 %v346_v53  ;;  %v310_v60 = vld [vmem:[%s1081_s7 + $0x200] sm:$0xff]  ;;  %v265_v27 = vld [vmem:[%s1081_s7 + $0x98] sm:$0xff] }
  0x44   : > { %v344_v57 = vld [vmem:[%s1081_s7 + $0x310] sm:$0xff]  ;;  %387 = vmatpush.msra.mxu0 %v250_v54  ;;  %v342_v61 = vld [vmem:[%s1081_s7 + $0x300] sm:$0xff]  ;;  %434 = vmatpush.msra.mxu2 %v312_v56  ;;  %v297_v29 = vld [vmem:[%s1081_s7 + $0x198] sm:$0xff] }
  0x45   : > { %v248_v58 = vld [vmem:[%s1081_s7 + $0x10] sm:$0xff]  ;;  %410 = vmatpush.msra.mxu1 %v282_v55  ;;  %457 = vmatpush.msra.mxu3 %v344_v57  ;;  %v246_v0 = vld [vmem:[%s1081_s7] sm:$0xff]  ;;  %v325_v30 = vld [vmem:[%s1081_s7 + $0x278] sm:$0xff] }
  0x46   : > { %v280_v59 = vld [vmem:[%s1081_s7 + $0x110] sm:$0xff]  ;;  %388 = vmatpush.msra.mxu0 %v248_v58  ;;  %v278_v1 = vld [vmem:[%s1081_s7 + $0x100] sm:$0xff]  ;;  %435 = vmatpush.msra.mxu2 %v310_v60  ;;  %v359_v31 = vld [vmem:[%s1081_s7 + $0x388] sm:$0xff] }
  0x47   : > { %411 = vmatpush.msra.mxu1 %v280_v59  ;;  %458 = vmatpush.msra.mxu3 %v342_v61  ;;  %v1179_v28 = vld [vmem:[#allocation3 + $0x10] sm:$0xff]  ;;  %v1184_v32 = vld [vmem:[#allocation3 + $0x18] sm:$0xff]  ;;  %v263_v33 = vld [vmem:[%s1081_s7 + $0x88] sm:$0xff] }
  0x48   : > { %512 = vmatpush.msrb.mxu2 %v341_v62  ;;  %389 = vmatpush.msra.mxu0 %v246_v0  ;;  %v295_v34 = vld [vmem:[%s1081_s7 + $0x188] sm:$0xff]  ;;  %v357_v36 = vld [vmem:[%s1081_s7 + $0x378] sm:$0xff]  ;;  %v1191_v37 = vld [vmem:[#allocation3] sm:$0xff] }
  0x49   : > { %535 = vmatpush.msrb.mxu3 %v373_v63  ;;  %412 = vmatpush.msra.mxu1 %v278_v1  ;;  %v323_v35 = vld [vmem:[%s1081_s7 + $0x268] sm:$0xff]  ;;  %v261_v39 = vld [vmem:[%s1081_s7 + $0x78] sm:$0xff]  ;;  %v244_v47 = vld [vmem:[#allocation3 + $0x30] sm:$0xff] }
  0x4a   : > { %513 = vmatpush.msrb.mxu2 %v339_v2  ;;  %466 = vmatpush.msrb.mxu0 %v277_v3  ;;  %v1194_v38 = vld [vmem:[#allocation3 + $0x8] sm:$0xff]  ;;  %v293_v40 = vld [vmem:[%s1081_s7 + $0x178] sm:$0xff]  ;;  %v242_v57 = vld [vmem:[#allocation3 + $0x20] sm:$0xff] }
  0x4b   : > { %489 = vmatpush.msrb.mxu1 %v309_v4  ;;  %536 = vmatpush.msrb.mxu3 %v371_v5  ;;  %v321_v41 = vld [vmem:[%s1081_s7 + $0x258] sm:$0xff]  ;;  %v355_v42 = vld [vmem:[%s1081_s7 + $0x368] sm:$0xff] }
  0x4c   : > { %514 = vmatpush.msrb.mxu2 %v337_v6  ;;  %467 = vmatpush.msrb.mxu0 %v275_v7  ;;  %v259_v43 = vld [vmem:[%s1081_s7 + $0x68] sm:$0xff]  ;;  %v353_v46 = vld [vmem:[%s1081_s7 + $0x358] sm:$0xff] }
  0x4d   : > { %490 = vmatpush.msrb.mxu1 %v307_v8  ;;  %537 = vmatpush.msrb.mxu3 %v369_v9  ;;  %v291_v44 = vld [vmem:[%s1081_s7 + $0x168] sm:$0xff]  ;;  %v257_v48 = vld [vmem:[%s1081_s7 + $0x58] sm:$0xff] }
  0x4e   : > { %515 = vmatpush.msrb.mxu2 %v335_v10  ;;  %468 = vmatpush.msrb.mxu0 %v273_v11  ;;  %v319_v45 = vld [vmem:[%s1081_s7 + $0x248] sm:$0xff]  ;;  %v289_v49 = vld [vmem:[%s1081_s7 + $0x158] sm:$0xff] }
  0x4f   : > { %491 = vmatpush.msrb.mxu1 %v305_v12  ;;  %538 = vmatpush.msrb.mxu3 %v367_v13  ;;  %v317_v50 = vld [vmem:[%s1081_s7 + $0x238] sm:$0xff]  ;;  %v351_v51 = vld [vmem:[%s1081_s7 + $0x348] sm:$0xff] }
  0x50   : > { %516 = vmatpush.msrb.mxu2 %v333_v14  ;;  %469 = vmatpush.msrb.mxu0 %v271_v15  ;;  %v245_v52 = vld [vmem:[#allocation3 + $0x38] sm:$0xff]  ;;  %v255_v53 = vld [vmem:[%s1081_s7 + $0x48] sm:$0xff] }
  0x51   : > { %492 = vmatpush.msrb.mxu1 %v303_v16  ;;  %539 = vmatpush.msrb.mxu3 %v365_v17  ;;  %v287_v54 = vld [vmem:[%s1081_s7 + $0x148] sm:$0xff]  ;;  %v349_v56 = vld [vmem:[%s1081_s7 + $0x338] sm:$0xff] }
  0x52   : > { %517 = vmatpush.msrb.mxu2 %v331_v18  ;;  %470 = vmatpush.msrb.mxu0 %v269_v19  ;;  %v315_v55 = vld [vmem:[%s1081_s7 + $0x228] sm:$0xff]  ;;  %v253_v59 = vld [vmem:[%s1081_s7 + $0x38] sm:$0xff] }
  0x53   : > { %493 = vmatpush.msrb.mxu1 %v301_v20  ;;  %540 = vmatpush.msrb.mxu3 %v363_v21  ;;  %v243_v58 = vld [vmem:[#allocation3 + $0x28] sm:$0xff]  ;;  %v285_v60 = vld [vmem:[%s1081_s7 + $0x138] sm:$0xff] }
  0x54   : > { %518 = vmatpush.msrb.mxu2 %v329_v22  ;;  %471 = vmatpush.msrb.mxu0 %v267_v23  ;;  %v313_v61 = vld [vmem:[%s1081_s7 + $0x218] sm:$0xff]  ;;  %v347_v62 = vld [vmem:[%s1081_s7 + $0x328] sm:$0xff] }
  0x55   : > { %494 = vmatpush.msrb.mxu1 %v299_v24  ;;  %541 = vmatpush.msrb.mxu3 %v361_v25  ;;  %v251_v63 = vld [vmem:[%s1081_s7 + $0x28] sm:$0xff]  ;;  %v345_v2 = vld [vmem:[%s1081_s7 + $0x318] sm:$0xff] }
  0x56   : > { %519 = vmatpush.msrb.mxu2 %v327_v26  ;;  %472 = vmatpush.msrb.mxu0 %v265_v27  ;;  %v283_v0 = vld [vmem:[%s1081_s7 + $0x128] sm:$0xff]  ;;  %v249_v3 = vld [vmem:[%s1081_s7 + $0x18] sm:$0xff] }
  0x57   : > { %436 = vmatmul.f32.vlgmr.msra.gmra.mxu2 %v1179_v28  ;;  %495 = vmatpush.msrb.mxu1 %v297_v29  ;;  %v311_v1 = vld [vmem:[%s1081_s7 + $0x208] sm:$0xff]  ;;  %v281_v4 = vld [vmem:[%s1081_s7 + $0x118] sm:$0xff] }
  0x58   : > { %520 = vmatpush.msrb.mxu2 %v325_v30  ;;  %542 = vmatpush.msrb.mxu3 %v359_v31  ;;  %v343_v5 = vld [vmem:[%s1081_s7 + $0x308] sm:$0xff] }
  0x59   : > { %459 = vmatmul.f32.vlgmr.msra.gmra.mxu3 %v1184_v32  ;;  %473 = vmatpush.msrb.mxu0 %v263_v33  ;;  %v247_v6 = vld [vmem:[%s1081_s7 + $0x8] sm:$0xff] }
  0x5a   : > { %496 = vmatpush.msrb.mxu1 %v295_v34  ;;  %521 = vmatpush.msrb.mxu2 %v323_v35  ;;  %v279_v7 = vld [vmem:[%s1081_s7 + $0x108] sm:$0xff] }
  0x5b   : > { %543 = vmatpush.msrb.mxu3 %v357_v36  ;;  %390 = vmatmul.f32.vlgmr.msra.gmra.mxu0 %v1191_v37 }
  0x5c   : > { %413 = vmatmul.f32.vlgmr.msra.gmra.mxu1 %v1194_v38  ;;  %474 = vmatpush.msrb.mxu0 %v261_v39 }
  0x5d   : > { %497 = vmatpush.msrb.mxu1 %v293_v40  ;;  %522 = vmatpush.msrb.mxu2 %v321_v41 }
  0x5e   : > { %544 = vmatpush.msrb.mxu3 %v355_v42  ;;  %475 = vmatpush.msrb.mxu0 %v259_v43 }
  0x5f   : > { %498 = vmatpush.msrb.mxu1 %v291_v44  ;;  %523 = vmatpush.msrb.mxu2 %v319_v45 }
  0x60   : > { %545 = vmatpush.msrb.mxu3 %v353_v46  ;;  %439 = vmatmul.f32.gmra.mxu2 %v244_v47 }
  0x61   : > { %476 = vmatpush.msrb.mxu0 %v257_v48  ;;  %499 = vmatpush.msrb.mxu1 %v289_v49 }
  0x62   : > { %524 = vmatpush.msrb.mxu2 %v317_v50  ;;  %546 = vmatpush.msrb.mxu3 %v351_v51 }
  0x63   : > { %462 = vmatmul.f32.gmra.mxu3 %v245_v52  ;;  %477 = vmatpush.msrb.mxu0 %v255_v53 }
  0x64   : > { %500 = vmatpush.msrb.mxu1 %v287_v54  ;;  %525 = vmatpush.msrb.mxu2 %v315_v55 }
  0x65   : > { %547 = vmatpush.msrb.mxu3 %v349_v56  ;;  %393 = vmatmul.f32.gmra.mxu0 %v242_v57 }
  0x66   : > { %416 = vmatmul.f32.gmra.mxu1 %v243_v58  ;;  %478 = vmatpush.msrb.mxu0 %v253_v59 }
  0x67   : > { %501 = vmatpush.msrb.mxu1 %v285_v60  ;;  %526 = vmatpush.msrb.mxu2 %v313_v61 }
  0x68   : > { %548 = vmatpush.msrb.mxu3 %v347_v62  ;;  %479 = vmatpush.msrb.mxu0 %v251_v63 }
  0x69   : > { %502 = vmatpush.msrb.mxu1 %v283_v0  ;;  %527 = vmatpush.msrb.mxu2 %v311_v1 }
  0x6a   : > { %549 = vmatpush.msrb.mxu3 %v345_v2  ;;  %528 = vmatmul.f32.vlgmr.msrb.gmra.mxu2 %v1179_v28 }
  0x6b   : > { %480 = vmatpush.msrb.mxu0 %v249_v3  ;;  %503 = vmatpush.msrb.mxu1 %v281_v4 }
  0x6c   : > { %550 = vmatpush.msrb.mxu3 %v343_v5 }
  0x6d   : > { %551 = vmatmul.f32.vlgmr.msrb.gmra.mxu3 %v1184_v32  ;;  %481 = vmatpush.msrb.mxu0 %v247_v6 }
  0x6e   : > { %504 = vmatpush.msrb.mxu1 %v279_v7  ;;  %482 = vmatmul.f32.vlgmr.msrb.gmra.mxu0 %v1191_v37 }
  0x6f   : > { %505 = vmatmul.f32.vlgmr.msrb.gmra.mxu1 %v1194_v38 }
  0x72   : > { %531 = vmatmul.f32.gmra.mxu2 %v244_v47 }
  0x75   : > { %554 = vmatmul.f32.gmra.mxu3 %v245_v52 }
  0x76   : > { %485 = vmatmul.f32.gmra.mxu0 %v242_v57 }
  0x77   : > { %508 = vmatmul.f32.gmra.mxu1 %v243_v58 }
  0xd8   : > { %v391_v8 = vpop.f32.mrf.mxu0 }
  0xd9   : > { %v414_v9 = vpop.f32.mrf.mxu1 }
  0xda   : > { %v415_v10 = vadd.f32 %v414_v9, %v391_v8  ;;  %v437_v11 = vpop.f32.mrf.mxu2 }
  0xdc   : > { %v438_v12 = vadd.f32 %v437_v11, %v415_v10  ;;  %v460_v13 = vpop.f32.mrf.mxu3 }
  0xde   : > { %v461_v14 = vadd.f32 %v460_v13, %v438_v12 }
  0xe0   : > { %573 = vst [vmem:[%s1232_s19] sm:$0xff] %v461_v14 }
  0xe2   : > { %v394_v15 = vpop.f32.mrf.mxu0 }
  0xe3   : > { %v417_v16 = vpop.f32.mrf.mxu1  ;;  %v440_v17 = vpop.f32.mrf.mxu2 }
  0xe4   : > { %v418_v18 = vadd.f32 %v417_v16, %v394_v15 }
  0xe6   : > { %v441_v19 = vadd.f32 %v440_v17, %v418_v18  ;;  %v463_v20 = vpop.f32.mrf.mxu3 }
  0xe8   : > { %v464_v21 = vadd.f32 %v463_v20, %v441_v19 }
  0xea   : > { %575 = vst [vmem:[%s1232_s19 + $0x10] sm:$0xff] %v464_v21 }
  0xeb   : > { %v483_v22 = vpop.f32.mrf.mxu0 }
  0xec   : > { %v506_v23 = vpop.f32.mrf.mxu1 }
  0xed   : > { %v507_v24 = vadd.f32 %v506_v23, %v483_v22  ;;  %v529_v25 = vpop.f32.mrf.mxu2 }
  0xef   : > { %v530_v26 = vadd.f32 %v529_v25, %v507_v24 }
  0xf0   : > { %v552_v27 = vpop.f32.mrf.mxu3 }
  0xf1   : > { %v553_v28 = vadd.f32 %v552_v27, %v530_v26 }
  0xf3   : > { %574 = vst [vmem:[%s1232_s19 + $0x8] sm:$0xff] %v553_v28  ;;  %v486_v29 = vpop.f32.mrf.mxu0 }
  0xf4   : > { %v509_v30 = vpop.f32.mrf.mxu1 }
  0xf5   : > { %v510_v31 = vadd.f32 %v509_v30, %v486_v29  ;;  %v532_v32 = vpop.f32.mrf.mxu2 }
  0xf7   : > { %v533_v33 = vadd.f32 %v532_v32, %v510_v31 }
  0xf8   : > { %v555_v34 = vpop.f32.mrf.mxu3 }
  0xf9   : > { %v556_v35 = vadd.f32 %v555_v34, %v533_v33 }
  0xfb   : > { %576 = vst [vmem:[%s1232_s19 + $0x18] sm:$0xff] %v556_v35 }
  0xfc   : > { %890 = shalt.err (!%p887_p12)
}
  0xfd   : > { %s957_s30 = smov 256   ;;  %s958_s6 = smov 1024  }
  0xfe   : > { %s959_s7 = smov 16  }
  0xff   : > { %728 = dma.vmem_to_hbm [thread:$0]  (%p1053_p3), %s594_s22, 512, %s596_s23, %s578_s12, %s957_s30, %s958_s6, %s959_s7  }
 0x100 PF: > { %p745_p13 = scmp.ge.s32.totalorder %s949_s14, 2  ;;  %s610_s17 = sand.u32 1, %s929_s9  }
 0x101   : > { %s611_s19 = scalar_lea.sflag [#allocation5], %s610_s17 }
 0x102   : > { %p739_p0 = pnand %p745_p13, %p1024_p6 }
 0x104   : > { %p740_p5 = pneg %p739_p0 }
 0x106   : > { %924 = dma.done.wait (%p740_p5), %s611_s19, 512  }
 0x107   : > { %926 = vsyncadd (%p740_p5), %s611_s19, 4294966784  ;;  %s19_s14 = sadd.s32 1, %s949_s14   ;;  %s1286_s9 = smov %s933_s10 }
 0x108   : > { %p16_p7 = scmp.ge.s32.totalorder %s19_s14, 6   ;;  %s1287_s10 = smov %s937_s11 }
 0x109   : > { %s1288_s11 = smov %s1062_s8  ;;  %s1289_s12 = smov %s945_s13 }
 0x10a   : > { %s1290_s13 = smov %s1292_s29  ;;  %18 = sbr.rel (!%p16_p7) target bundleno = 7 (0x7), region = 87 }
 0x10f   :  { %617 = vsyncpa [#allocation4], 1 }
 0x110   :  { %619 = vsyncpa [#allocation4 + $0x1], 1 }
 0x111   :  { %620 = vsyncpa [#allocation7], 1 }
 0x112   :  { %622 = vsyncpa [#allocation7 + $0x1], 1 }
 0x113   :  { %623 = vsyncpa [#allocation5], 1 }
 0x114   :  { %625 = vsyncpa [#allocation5 + $0x1], 1 }

</bundles_post_ra>
